<compile_context>
chip_gen: v7x
topology: tpu7x:2x2x1
jax: 0.10.0
libtpu: 0.0.40
codegen_flags: <defaults>
</compile_context>

<pallas_src>
import jax
import jax.numpy as jnp
from jax.experimental import pallas as pl
from jax.experimental.pallas import tpu as pltpu

INPUT_SIZE = 2
HIDDEN = 64
OUTPUT_SIZE = 4  # len(['left', 'right', 'up', 'down'])

# Lane-dense padded sizes for the in-register MXU matmuls.
HIDDEN_PAD = 128
OUTPUT_PAD = 128

DEFAULT_TILE_B = 4096          # batch tile (review: 2048-4096)
MIN_TILE_B = 16                # multiple of 16 -> safe for bf16 sublane tiling
VMEM_LIMIT_BYTES = 32 * 1024 * 1024

OUT_BF16 = False               # opt-in: bf16 Q-value output (halves writeback)


def _is_v5e():
    """Enable bf16 MXU operands on v5e, where f32 matmuls are multi-pass."""
    try:
        kind = jax.devices()[0].device_kind.lower()
        return ("v5e" in kind) or ("v5 lite" in kind) or ("v5lite" in kind)
    except Exception:
        return False


MXU_BF16 = _is_v5e()


def _round_up(n, m):
    return (n + m - 1) // m * m


def dqn_kernel(x_ref, w1_ref, b1_ref, w2_ref, b2_ref, w3_ref, b3_ref, o_ref):
    x = x_ref[...]        # (TILE_B, 2) f32
    w1 = w1_ref[...]      # (2, HIDDEN_PAD) f32

    # fc1 + ReLU: a K=2 matmul wastes the MXU -> two broadcast VPU FMAs (f32).
    h1 = x[:, 0:1] * w1[0:1, :] + x[:, 1:2] * w1[1:2, :] + b1_ref[...]
    h1 = jnp.maximum(h1, 0.0)

    w2 = w2_ref[...]      # (128, 128), f32 or pre-cast bf16
    w3 = w3_ref[...]      # (128, 128), f32 or pre-cast bf16
    mxu_bf16 = w2_ref.dtype == jnp.bfloat16
    if mxu_bf16:
        h1 = h1.astype(jnp.bfloat16)

    # fc2 + ReLU: (TILE_B,128)@(128,128) on the MXU, f32 accumulation.
    h2 = jnp.dot(h1, w2, preferred_element_type=jnp.float32) + b2_ref[...]
    h2 = jnp.maximum(h2, 0.0)
    if mxu_bf16:
        h2 = h2.astype(jnp.bfloat16)

    # fc3: keep the matmul 128-wide in-register, but store ONLY the 4 real
    # Q-value columns to HBM (the 128-wide writeback was the dominant cost).
    out = jnp.dot(h2, w3, preferred_element_type=jnp.float32) + b3_ref[...]
    o_ref[...] = out[:, :OUTPUT_SIZE].astype(o_ref.dtype)


def prepare_params(params):
    """Zero-pad the logical (2,64)/(64,64)/(64,4) params to lane-dense shapes.

    When MXU_BF16 is enabled (v5e), w2/w3 are pre-cast to bf16 once here so no
    per-grid-step weight cast happens in the kernel. Biases stay f32 (added
    after the f32-accumulated dot); w1/b1 stay f32 (VPU path).
    """
    w1, b1, w2, b2, w3, b3 = params
    w1p = jnp.zeros((INPUT_SIZE, HIDDEN_PAD), jnp.float32).at[:, :HIDDEN].set(w1)
    b1p = jnp.zeros((1, HIDDEN_PAD), jnp.float32).at[:, :HIDDEN].set(b1)
    w2p = jnp.zeros((HIDDEN_PAD, HIDDEN_PAD), jnp.float32).at[:HIDDEN, :HIDDEN].set(w2)
    b2p = jnp.zeros((1, HIDDEN_PAD), jnp.float32).at[:, :HIDDEN].set(b2)
    w3p = jnp.zeros((HIDDEN_PAD, OUTPUT_PAD), jnp.float32).at[:HIDDEN, :OUTPUT_SIZE].set(w3)
    b3p = jnp.zeros((1, OUTPUT_PAD), jnp.float32).at[:, :OUTPUT_SIZE].set(b3)
    if MXU_BF16:
        w2p = w2p.astype(jnp.bfloat16)
        w3p = w3p.astype(jnp.bfloat16)
    return (w1p, b1p, w2p, b2p, w3p, b3p)


@jax.jit
def dqn_forward(x, padded_params):
    """Fused DQN forward: x (B, 2) float32 -> Q-values (B, 4)."""
    w1p, b1p, w2p, b2p, w3p, b3p = padded_params
    B = x.shape[0]
    out_dtype = jnp.bfloat16 if OUT_BF16 else jnp.float32

    tile_b = min(DEFAULT_TILE_B, _round_up(max(B, 1), MIN_TILE_B))
    # v7x megacore: guarantee >= 2 grid steps when the batch allows it so the
    # "parallel" batch axis actually shards across both TensorCores.
    if B >= 2 * MIN_TILE_B:
        tile_b = min(tile_b, _round_up((B + 1) // 2, MIN_TILE_B))
    b_pad = _round_up(B, tile_b)
    if b_pad != B:
        x = jnp.pad(x, ((0, b_pad - B), (0, 0)))
    grid = (b_pad // tile_b,)

    # Advisory cost: tiny FLOPs, bytes-bound.
    param_bytes = sum(int(p.size) * p.dtype.itemsize
                      for p in (w1p, b1p, w2p, b2p, w3p, b3p))
    cost = pl.CostEstimate(
        flops=2 * b_pad * (INPUT_SIZE * HIDDEN + HIDDEN * HIDDEN + HIDDEN * OUTPUT_SIZE),
        transcendentals=0,
        bytes_accessed=b_pad * INPUT_SIZE * 4
        + b_pad * OUTPUT_SIZE * jnp.dtype(out_dtype).itemsize
        + param_bytes,
    )

    resident = lambda i: (0, 0)  # weights/biases stay VMEM-resident across the grid
    out = pl.pallas_call(
        dqn_kernel,
        out_shape=jax.ShapeDtypeStruct((b_pad, OUTPUT_SIZE), out_dtype),
        grid=grid,
        in_specs=[
            # TODO(synk): x is lane-sparse in VMEM ((tile_b,2) pads to 128 lanes);
            # budgeted for in VMEM_LIMIT_BYTES rather than pre-packed.
            pl.BlockSpec((tile_b, INPUT_SIZE), lambda i: (i, 0)),
            pl.BlockSpec((INPUT_SIZE, HIDDEN_PAD), resident),
            pl.BlockSpec((1, HIDDEN_PAD), resident),
            pl.BlockSpec((HIDDEN_PAD, HIDDEN_PAD), resident),
            pl.BlockSpec((1, HIDDEN_PAD), resident),
            pl.BlockSpec((HIDDEN_PAD, OUTPUT_PAD), resident),
            pl.BlockSpec((1, OUTPUT_PAD), resident),
        ],
        # Un-padded output: only 4 real columns ever hit HBM.
        out_specs=pl.BlockSpec((tile_b, OUTPUT_SIZE), lambda i: (i, 0)),
        compiler_params=pltpu.CompilerParams(
            dimension_semantics=("parallel",),
            vmem_limit_bytes=VMEM_LIMIT_BYTES,
        ),
        cost_estimate=cost,
    )(x, w1p, b1p, w2p, b2p, w3p, b3p)

    return out[:B]


def init_params(key):
    """Deterministic init mirroring nn.Linear default (uniform +/- 1/sqrt(fan_in))."""
    ks = jax.random.split(key, 6)

    def linear(kw, kb, fan_in, fan_out):
        bound = 1.0 / jnp.sqrt(fan_in)
        w = jax.random.uniform(kw, (fan_in, fan_out), jnp.float32, -bound, bound)
        b = jax.random.uniform(kb, (1, fan_out), jnp.float32, -bound, bound)
        return w, b

    w1, b1 = linear(ks[0], ks[1], INPUT_SIZE, HIDDEN)
    w2, b2 = linear(ks[2], ks[3], HIDDEN, HIDDEN)
    w3, b3 = linear(ks[4], ks[5], HIDDEN, OUTPUT_SIZE)
    return (w1, b1, w2, b2, w3, b3)


def dqn_reference(x, params):
    """Pure-JAX reference matching the PyTorch module's forward."""
    w1, b1, w2, b2, w3, b3 = params
    h1 = jnp.maximum(x @ w1 + b1, 0.0)
    h2 = jnp.maximum(h1 @ w2 + b2, 0.0)
    return h2 @ w3 + b3


if __name__ == "__main__":
    key = jax.random.PRNGKey(0)
    k_params, k_x1, k_x2 = jax.random.split(key, 3)

    params = init_params(k_params)
    padded_params = prepare_params(params)

    # bf16 MXU operands (v5e path) need a looser tolerance; exact otherwise.
    atol, rtol = (2.5e-1, 2.5e-2) if (MXU_BF16 or OUT_BF16) else (1e-4, 1e-4)

    # 1) Small batch of (row, col)-style grid-world states: single grid step.
    B = 8
    x = jax.random.uniform(k_x1, (B, INPUT_SIZE), jnp.float32, 0.0, 10.0)
    out = jax.block_until_ready(dqn_forward(x, padded_params))
    ref = dqn_reference(x, params)
    assert out.shape == (B, OUTPUT_SIZE)
    assert jnp.allclose(out.astype(jnp.float32), ref, atol=atol, rtol=rtol), \
        "mismatch vs reference (single-tile path)"

    # 2) Ragged, multi-tile batch: exercises the pipelined multi-step grid and
    #    the B-not-a-multiple-of-tile_b padding path (review concern).
    B2 = 1000
    x2 = jax.random.uniform(k_x2, (B2, INPUT_SIZE), jnp.float32, 0.0, 10.0)
    out2 = jax.block_until_ready(dqn_forward(x2, padded_params))
    ref2 = dqn_reference(x2, params)
    assert out2.shape == (B2, OUTPUT_SIZE)
    assert jnp.allclose(out2.astype(jnp.float32), ref2, atol=atol, rtol=rtol), \
        "mismatch vs reference (multi-tile / ragged path)"

    print("KERNEL_OK")
</pallas_src>

<mosaic_0001>
module attributes {stable_mosaic.version = 11 : i64} {
  func.func @dqn_kernel(%arg0: i32, %arg1: memref<16x2xf32, #tpu.memory_space<vmem>>, %arg2: memref<2x128xf32, #tpu.memory_space<vmem>>, %arg3: memref<1x128xf32, #tpu.memory_space<vmem>>, %arg4: memref<128x128xf32, #tpu.memory_space<vmem>>, %arg5: memref<1x128xf32, #tpu.memory_space<vmem>>, %arg6: memref<128x128xf32, #tpu.memory_space<vmem>>, %arg7: memref<1x128xf32, #tpu.memory_space<vmem>>, %arg8: memref<16x4xf32, #tpu.memory_space<vmem>>) attributes {dimension_semantics = [#tpu.dimension_semantics<parallel>], iteration_bounds = array<i64: 1>, scalar_prefetch = 0 : i64, scratch_operands = 0 : i64, tpu.core_type = #tpu.core_type<tc>, window_params = [{transform_indices = @transform_0, window_bounds = array<i64: 16, 2>}, {pipeline_mode = #tpu.pipeline_mode<synchronous>, transform_indices = @transform_1, window_bounds = array<i64: 2, 128>}, {pipeline_mode = #tpu.pipeline_mode<synchronous>, transform_indices = @transform_2, window_bounds = array<i64: 1, 128>}, {pipeline_mode = #tpu.pipeline_mode<synchronous>, transform_indices = @transform_3, window_bounds = array<i64: 128, 128>}, {pipeline_mode = #tpu.pipeline_mode<synchronous>, transform_indices = @transform_4, window_bounds = array<i64: 1, 128>}, {pipeline_mode = #tpu.pipeline_mode<synchronous>, transform_indices = @transform_5, window_bounds = array<i64: 128, 128>}, {pipeline_mode = #tpu.pipeline_mode<synchronous>, transform_indices = @transform_6, window_bounds = array<i64: 1, 128>}, {transform_indices = @transform_7, window_bounds = array<i64: 16, 4>}]} {
    %c0 = arith.constant 0 : index
    %c0_0 = arith.constant 0 : index
    %0 = vector.load %arg1[%c0, %c0_0] : memref<16x2xf32, #tpu.memory_space<vmem>>, vector<16x2xf32>
    %c0_1 = arith.constant 0 : index
    %c0_2 = arith.constant 0 : index
    %1 = vector.load %arg2[%c0_1, %c0_2] : memref<2x128xf32, #tpu.memory_space<vmem>>, vector<2x128xf32>
    %2 = vector.extract_strided_slice %0 {offsets = [0, 0], sizes = [16, 1], strides = [1, 1]} : vector<16x2xf32> to vector<16x1xf32>
    %3 = vector.extract_strided_slice %1 {offsets = [0, 0], sizes = [1, 128], strides = [1, 1]} : vector<2x128xf32> to vector<1x128xf32>
    %4 = vector.broadcast %2 : vector<16x1xf32> to vector<16x128xf32>
    %5 = vector.broadcast %3 : vector<1x128xf32> to vector<16x128xf32>
    %6 = arith.mulf %4, %5 : vector<16x128xf32>
    %7 = vector.extract_strided_slice %0 {offsets = [0, 1], sizes = [16, 1], strides = [1, 1]} : vector<16x2xf32> to vector<16x1xf32>
    %8 = vector.extract_strided_slice %1 {offsets = [1, 0], sizes = [1, 128], strides = [1, 1]} : vector<2x128xf32> to vector<1x128xf32>
    %9 = vector.broadcast %7 : vector<16x1xf32> to vector<16x128xf32>
    %10 = vector.broadcast %8 : vector<1x128xf32> to vector<16x128xf32>
    %11 = arith.mulf %9, %10 : vector<16x128xf32>
    %12 = arith.addf %6, %11 : vector<16x128xf32>
    %c0_3 = arith.constant 0 : index
    %c0_4 = arith.constant 0 : index
    %13 = vector.load %arg3[%c0_3, %c0_4] : memref<1x128xf32, #tpu.memory_space<vmem>>, vector<1x128xf32>
    %14 = vector.broadcast %13 : vector<1x128xf32> to vector<16x128xf32>
    %15 = arith.addf %12, %14 : vector<16x128xf32>
    %cst = arith.constant 0.000000e+00 : f32
    %16 = vector.broadcast %cst : f32 to vector<16x128xf32>
    %17 = arith.maximumf %15, %16 : vector<16x128xf32>
    %c0_5 = arith.constant 0 : index
    %c0_6 = arith.constant 0 : index
    %18 = vector.load %arg4[%c0_5, %c0_6] : memref<128x128xf32, #tpu.memory_space<vmem>>, vector<128x128xf32>
    %c0_7 = arith.constant 0 : index
    %c0_8 = arith.constant 0 : index
    %19 = vector.load %arg6[%c0_7, %c0_8] : memref<128x128xf32, #tpu.memory_space<vmem>>, vector<128x128xf32>
    %cst_9 = arith.constant dense<0.000000e+00> : vector<16x128xf32>
    %20 = tpu.matmul %17, %18, %cst_9 {dimension_numbers = #tpu.dot_dimension_numbers<[1], [0], [0], [1], [0, 0, 1, 1], [], []>} : vector<16x128xf32>, vector<128x128xf32>, vector<16x128xf32> -> vector<16x128xf32>
    %c0_10 = arith.constant 0 : index
    %c0_11 = arith.constant 0 : index
    %21 = vector.load %arg5[%c0_10, %c0_11] : memref<1x128xf32, #tpu.memory_space<vmem>>, vector<1x128xf32>
    %22 = vector.broadcast %21 : vector<1x128xf32> to vector<16x128xf32>
    %23 = arith.addf %20, %22 : vector<16x128xf32>
    %cst_12 = arith.constant 0.000000e+00 : f32
    %24 = vector.broadcast %cst_12 : f32 to vector<16x128xf32>
    %25 = arith.maximumf %23, %24 : vector<16x128xf32>
    %cst_13 = arith.constant dense<0.000000e+00> : vector<16x128xf32>
    %26 = tpu.matmul %25, %19, %cst_13 {dimension_numbers = #tpu.dot_dimension_numbers<[1], [0], [0], [1], [0, 0, 1, 1], [], []>} : vector<16x128xf32>, vector<128x128xf32>, vector<16x128xf32> -> vector<16x128xf32>
    %c0_14 = arith.constant 0 : index
    %c0_15 = arith.constant 0 : index
    %27 = vector.load %arg7[%c0_14, %c0_15] : memref<1x128xf32, #tpu.memory_space<vmem>>, vector<1x128xf32>
    %28 = vector.broadcast %27 : vector<1x128xf32> to vector<16x128xf32>
    %29 = arith.addf %26, %28 : vector<16x128xf32>
    %30 = vector.extract_strided_slice %29 {offsets = [0, 0], sizes = [16, 4], strides = [1, 1]} : vector<16x128xf32> to vector<16x4xf32>
    %c0_16 = arith.constant 0 : index
    %c0_17 = arith.constant 0 : index
    %31 = vector.load %arg8[%c0_16, %c0_17] : memref<16x4xf32, #tpu.memory_space<vmem>>, vector<16x4xf32>
    tpu.vector_store %arg8[%c0_16, %c0_17], %30 {strides = array<i32>} : memref<16x4xf32, #tpu.memory_space<vmem>>, vector<16x4xf32>,
    return
  }
  func.func @transform_0(%arg0: i32) -> (i32, i32) {
    %c0_i32 = arith.constant 0 : i32
    %c0_i32_0 = arith.constant 0 : i32
    return %arg0, %c0_i32 : i32, i32
  }
  func.func @transform_1(%arg0: i32) -> (i32, i32) {
    %c0_i32 = arith.constant 0 : i32
    %c0_i32_0 = arith.constant 0 : i32
    %c0_i32_1 = arith.constant 0 : i32
    return %c0_i32, %c0_i32_0 : i32, i32
  }
  func.func @transform_2(%arg0: i32) -> (i32, i32) {
    %c0_i32 = arith.constant 0 : i32
    %c0_i32_0 = arith.constant 0 : i32
    %c0_i32_1 = arith.constant 0 : i32
    return %c0_i32, %c0_i32_0 : i32, i32
  }
  func.func @transform_3(%arg0: i32) -> (i32, i32) {
    %c0_i32 = arith.constant 0 : i32
    %c0_i32_0 = arith.constant 0 : i32
    %c0_i32_1 = arith.constant 0 : i32
    return %c0_i32, %c0_i32_0 : i32, i32
  }
  func.func @transform_4(%arg0: i32) -> (i32, i32) {
    %c0_i32 = arith.constant 0 : i32
    %c0_i32_0 = arith.constant 0 : i32
    %c0_i32_1 = arith.constant 0 : i32
    return %c0_i32, %c0_i32_0 : i32, i32
  }
  func.func @transform_5(%arg0: i32) -> (i32, i32) {
    %c0_i32 = arith.constant 0 : i32
    %c0_i32_0 = arith.constant 0 : i32
    %c0_i32_1 = arith.constant 0 : i32
    return %c0_i32, %c0_i32_0 : i32, i32
  }
  func.func @transform_6(%arg0: i32) -> (i32, i32) {
    %c0_i32 = arith.constant 0 : i32
    %c0_i32_0 = arith.constant 0 : i32
    %c0_i32_1 = arith.constant 0 : i32
    return %c0_i32, %c0_i32_0 : i32, i32
  }
  func.func @transform_7(%arg0: i32) -> (i32, i32) {
    %c0_i32 = arith.constant 0 : i32
    %c0_i32_0 = arith.constant 0 : i32
    return %arg0, %c0_i32 : i32, i32
  }
}

</mosaic_0001>

<bundles_post_ra>
// kernel: dqn_forward.1
= control target key start
LH: loop header
LB: loop body
LE: loop exit
PB: predicated region body
PF: predicated region fallthrough
CT: control target
= control target key end

     0   :  { %12 = vsyncpa [#allocation3], 0  ;;  %s632_s0 = inlined_call_operand.vmem [shape: f32[16,2], index: 0, kind: input, shape index: {}]   ;;  %s633_s1 = inlined_call_operand.vmem [shape: f32[2,128], index: 1, kind: input, shape index: {}]   ;;  %s634_s2 = inlined_call_operand.vmem [shape: f32[1,128], index: 2, kind: input, shape index: {}]   ;;  %s635_s3 = inlined_call_operand.hbm [shape: f32[128,128], index: 3, kind: input, shape index: {}]   ;;  %s636_s4 = inlined_call_operand.vmem [shape: f32[1,128], index: 4, kind: input, shape index: {}]   ;;  %s637_s5 = inlined_call_operand.hbm [shape: f32[128,128], index: 5, kind: input, shape index: {}]   ;;  %s638_s6 = inlined_call_operand.vmem [shape: f32[1,128], index: 6, kind: input, shape index: {}]   ;;  %s639_s7 = inlined_call_operand.vmem [shape: f32[16,4], index: 7, kind: output, shape index: {}]  }
   0x1   :  { %13 = vsyncpa [#allocation5], 0  ;;  %s538_s24 = smov [#allocation2]   ;;  %s490_s28 = scalar_lea.hbm %s635_s3, 2048 }
   0x2   :  { %s25_s25 = sshll.u32 %s538_s24, 4  ;;  %p491_p0 = scmp.ne.s32.totalorder %s635_s3, %s490_s28  ;;  %s26_s25 = int_to_ptr.vmem [resolvable:$true] %s25_s25 }
   0x3   :  { %p494_p1 = scmp.lt.u32.totalorder %s490_s28, %s635_s3 }
   0x5   :  { %p496_p2 = pnand %p494_p1, %p491_p0 }
   0x7   :  { %499 = shalt.err (!%p496_p2)
}
   0x8   :  { %s500_s10 = scalar_lea.vmem %s26_s25, 2048  ;;  %p505_p4 = scmp.lt.s32.totalorder %s26_s25, %s26_s25 }
   0x9   :  { %p501_p3 = scmp.ne.s32.totalorder %s26_s25, %s500_s10  ;;  %p506_p5 = scmp.lt.s32.totalorder %s500_s10, %s500_s10 }
   0xb   :  { %p507_p6 = por %p506_p5, %p505_p4 }
   0xd   :  { %p508_p7 = pnand %p507_p6, %p501_p3 }
   0xf   :  { %511 = shalt.err (!%p508_p7)
}
  0x10   :  { %s539_s11 = smov 128   ;;  %s540_s12 = smov 8  }
  0x11   :  { %31 = dma.hbm_to_vmem [thread:$0]  %s635_s3, 2048, %s26_s25, [#allocation3], %s539_s11, %s539_s11, %s540_s12  }
  0x12   :  { %s541_s15 = smov [#allocation4]   ;;  %s512_s19 = scalar_lea.hbm %s637_s5, 2048 }
  0x13   :  { %s39_s16 = sshll.u32 %s541_s15, 4  ;;  %p513_p8 = scmp.ne.s32.totalorder %s637_s5, %s512_s19  ;;  %s40_s16 = int_to_ptr.vmem [resolvable:$true] %s39_s16 }
  0x14   :  { %p516_p9 = scmp.lt.u32.totalorder %s512_s19, %s637_s5 }
  0x16   :  { %p518_p10 = pnand %p516_p9, %p513_p8 }
  0x18   :  { %521 = shalt.err (!%p518_p10)
}
  0x19   :  { %s522_s24 = scalar_lea.vmem %s40_s16, 2048  ;;  %p527_p12 = scmp.lt.s32.totalorder %s40_s16, %s40_s16 }
  0x1a   :  { %p523_p11 = scmp.ne.s32.totalorder %s40_s16, %s522_s24  ;;  %p528_p13 = scmp.lt.s32.totalorder %s522_s24, %s522_s24 }
  0x1c   :  { %p529_p0 = por %p528_p13, %p527_p12 }
  0x1e   :  { %p530_p1 = pnand %p529_p0, %p523_p11 }
  0x20   :  { %533 = shalt.err (!%p530_p1)
}
  0x21   :  { %45 = dma.hbm_to_vmem [thread:$0]  %s637_s5, 2048, %s40_s16, [#allocation5], %s539_s11, %s539_s11, %s540_s12  }
  0x22   :  { %534 = dma.done.wait [#allocation3], 2048  }
  0x23   :  { %535 = vsyncadd [#allocation3], 4294965248 }
  0x24   :  { %536 = dma.done.wait [#allocation5], 2048  }
  0x25   :  { %537 = vsyncadd [#allocation5], 4294965248  ;;  %v542_v0 = vmov 0   ;;  %v55_v1 = vld [vmem:[%s632_s0 + $0x8] sm:$0xff]  ;;  %v54_v2 = vld [vmem:[%s632_s0] sm:$0xff]  ;;  %v543_v9 = vmov 1   ;;  %v67_v49 = vlaneseq }
  0x26   :  { %488 = vset.pattern.permute.xlu1 %v542_v0  ;;  %486 = vset.pattern.permute.xlu0 %v542_v0  ;;  %v100_v3 = vld [vmem:[#allocation2] sm:$0xff]  ;;  %v101_v4 = vld [vmem:[#allocation2 + $0x8] sm:$0xff]  ;;  %v102_v5 = vld [vmem:[#allocation2 + $0x10] sm:$0xff]  ;;  %vm298_vm0 = vcmask 31744  }
  0x27   :  { %64 = vperm.xlu1 %488, %v55_v1   ;;  %59 = vperm.xlu0 %486, %v54_v2   ;;  %v103_v6 = vld [vmem:[#allocation2 + $0x18] sm:$0xff]  ;;  %v416_v7 = vpack.c.bf16 %v101_v4, %v100_v3  ;;  %v104_v10 = vld [vmem:[#allocation2 + $0x20] sm:$0xff]  ;;  %v105_v11 = vld [vmem:[#allocation2 + $0x28] sm:$0xff]  ;;  %v68_v50 = vshrl.u32 %v67_v49, 7 }
  0x28   :  { %v420_v8 = vpack.c.bf16 %v103_v6, %v102_v5  ;;  %v424_v12 = vpack.c.bf16 %v105_v11, %v104_v10  ;;  %v106_v13 = vld [vmem:[#allocation2 + $0x30] sm:$0xff]  ;;  %v107_v14 = vld [vmem:[#allocation2 + $0x38] sm:$0xff]  ;;  %v108_v16 = vld [vmem:[#allocation2 + $0x40] sm:$0xff] }
  0x29   :  { %417 = vmatprep.subr.bf16.mxu0 %v416_v7  ;;  %v428_v15 = vpack.c.bf16 %v107_v14, %v106_v13  ;;  %v109_v17 = vld [vmem:[#allocation2 + $0x48] sm:$0xff]  ;;  %v116_v18 = vld [vmem:[#allocation4] sm:$0xff]  ;;  %v118_v20 = vld [vmem:[#allocation4 + $0x10] sm:$0xff]  ;;  %v69_v51 = vsub.s32 0, %v68_v50  ;;  %v83_v52 = vsub.s32 1, %v68_v50 }
  0x2a   :  { %419 = vmatpush3.bf16.msra.mxu0 %v416_v7  ;;  %v117_v19 = vld [vmem:[#allocation4 + $0x8] sm:$0xff]  ;;  %v432_v21 = vpack.c.bf16 %v109_v17, %v108_v16  ;;  %v110_v22 = vld [vmem:[#allocation2 + $0x50] sm:$0xff]  ;;  %v119_v24 = vld [vmem:[#allocation4 + $0x18] sm:$0xff] }
  0x2b   :  { %489 = vset.pattern.permute.xlu1 %v543_v9  ;;  %487 = vset.pattern.permute.xlu0 %v543_v9  ;;  %v448_v23 = vpack.c.bf16 %v117_v19, %v116_v18  ;;  %v111_v25 = vld [vmem:[#allocation2 + $0x58] sm:$0xff]  ;;  %v452_v26 = vpack.c.bf16 %v119_v24, %v118_v20  ;;  %v120_v27 = vld [vmem:[#allocation4 + $0x20] sm:$0xff]  ;;  %v121_v28 = vld [vmem:[#allocation4 + $0x28] sm:$0xff] }
  0x2c   :  { %78 = vperm.xlu1 %489, %v55_v1   ;;  %74 = vperm.xlu0 %487, %v54_v2   ;;  %v436_v29 = vpack.c.bf16 %v111_v25, %v110_v22  ;;  %v112_v30 = vld [vmem:[#allocation2 + $0x60] sm:$0xff]  ;;  %v456_v31 = vpack.c.bf16 %v121_v28, %v120_v27  ;;  %v113_v32 = vld [vmem:[#allocation2 + $0x68] sm:$0xff]  ;;  %v122_v33 = vld [vmem:[#allocation4 + $0x30] sm:$0xff] }
  0x2d   :  { %421 = vmatprep.subr.bf16.mxu0 %v420_v8  ;;  %449 = vmatprep.subr.bf16.mxu1 %v448_v23  ;;  %v123_v34 = vld [vmem:[#allocation4 + $0x38] sm:$0xff]  ;;  %v440_v35 = vpack.c.bf16 %v113_v32, %v112_v30  ;;  %v114_v36 = vld [vmem:[#allocation2 + $0x70] sm:$0xff]  ;;  %v124_v39 = vld [vmem:[#allocation4 + $0x40] sm:$0xff] }
  0x2e   :  { %423 = vmatpush3.bf16.msra.mxu0 %v420_v8  ;;  %451 = vmatpush3.bf16.msra.mxu1 %v448_v23  ;;  %v460_v37 = vpack.c.bf16 %v123_v34, %v122_v33  ;;  %v115_v38 = vld [vmem:[#allocation2 + $0x78] sm:$0xff]  ;;  %v125_v40 = vld [vmem:[#allocation4 + $0x48] sm:$0xff]  ;;  %v126_v43 = vld [vmem:[#allocation4 + $0x50] sm:$0xff] }
  0x2f   :  { %425 = vmatprep.subr.bf16.mxu0 %v424_v12  ;;  %453 = vmatprep.subr.bf16.mxu1 %v452_v26  ;;  %v444_v41 = vpack.c.bf16 %v115_v38, %v114_v36  ;;  %v464_v42 = vpack.c.bf16 %v125_v40, %v124_v39  ;;  %v127_v44 = vld [vmem:[#allocation4 + $0x58] sm:$0xff]  ;;  %v128_v46 = vld [vmem:[#allocation4 + $0x60] sm:$0xff]  ;;  %v129_v47 = vld [vmem:[#allocation4 + $0x68] sm:$0xff] }
  0x30   :  { %v468_v45 = vpack.c.bf16 %v127_v44, %v126_v43  ;;  %v472_v48 = vpack.c.bf16 %v129_v47, %v128_v46  ;;  %v56_v53 = vld [vmem:[%s633_s1] sm:$0x3]  ;;  %v130_v7 = vld [vmem:[#allocation4 + $0x70] sm:$0xff]  ;;  %v131_v8 = vld [vmem:[#allocation4 + $0x78] sm:$0xff] }
  0x31   :  { %v70_v56 = vrot.slane %v56_v53, %v69_v51  ;;  %v84_v57 = vrot.slane %v56_v53, %v83_v52  ;;  %v307_v0 = vld [vmem:[%s634_s2] ss:$0 sm:$0xff]  ;;  %v476_v9 = vpack.c.bf16 %v131_v8, %v130_v7 }
  0x32   :  { %427 = vmatpush3.bf16.msra.mxu0 %v424_v12  ;;  %455 = vmatpush3.bf16.msra.mxu1 %v452_v26  ;;  %v308_v10 = vld [vmem:[%s636_s4] ss:$0 sm:$0xff] }
  0x33   :  { %429 = vmatprep.subr.bf16.mxu0 %v428_v15  ;;  %457 = vmatprep.subr.bf16.mxu1 %v456_v31  ;;  %v309_v17 = vld [vmem:[%s638_s6] ss:$0 sm:$0xff] }
  0x36   :  { %431 = vmatpush3.bf16.msra.mxu0 %v428_v15  ;;  %459 = vmatpush3.bf16.msra.mxu1 %v456_v31 }
  0x37   :  { %433 = vmatprep.subr.bf16.mxu0 %v432_v21  ;;  %461 = vmatprep.subr.bf16.mxu1 %v460_v37 }
  0x3a   :  { %435 = vmatpush3.bf16.msra.mxu0 %v432_v21  ;;  %463 = vmatpush3.bf16.msra.mxu1 %v460_v37 }
  0x3b   :  { %437 = vmatprep.subr.bf16.mxu0 %v436_v29  ;;  %465 = vmatprep.subr.bf16.mxu1 %v464_v42 }
  0x3e   :  { %439 = vmatpush3.bf16.msra.mxu0 %v436_v29  ;;  %467 = vmatpush3.bf16.msra.mxu1 %v464_v42 }
  0x3f   :  { %441 = vmatprep.subr.bf16.mxu0 %v440_v35  ;;  %469 = vmatprep.subr.bf16.mxu1 %v468_v45 }
  0x42   :  { %443 = vmatpush3.bf16.msra.mxu0 %v440_v35  ;;  %471 = vmatpush3.bf16.msra.mxu1 %v468_v45 }
  0x43   :  { %445 = vmatprep.subr.bf16.mxu0 %v444_v41  ;;  %473 = vmatprep.subr.bf16.mxu1 %v472_v48 }
  0x46   :  { %447 = vmatpush3.bf16.msra.mxu0 %v444_v41  ;;  %475 = vmatpush3.bf16.msra.mxu1 %v472_v48 }
  0x47   :  { %477 = vmatprep.subr.bf16.mxu1 %v476_v9 }
  0x4a   :  { %479 = vmatpush3.bf16.msra.mxu1 %v476_v9 }
  0xa6   :  { %v60_v54 = vpop.permute.xlu0 %59  ;;  %v65_v55 = vpop.permute.xlu1 %64 }
  0xa7   :  { %v71_v60 = vmul.f32 %v70_v56, %v60_v54  ;;  %v72_v61 = vmul.f32 %v70_v56, %v65_v55 }
  0xab   :  { %v79_v58 = vpop.permute.xlu1 %78  ;;  %v75_v59 = vpop.permute.xlu0 %74 }
  0xac   :  { %v86_v62 = vmul.f32 %v84_v57, %v79_v58  ;;  %v85_v63 = vmul.f32 %v84_v57, %v75_v59 }
  0xae   :  { %v88_v1 = vadd.f32 %v86_v62, %v72_v61  ;;  %v87_v2 = vadd.f32 %v85_v63, %v71_v60 }
  0xb0   :  { %v96_v3 = vadd.f32 %v307_v0, %v87_v2  ;;  %v97_v4 = vadd.f32 %v307_v0, %v88_v1 }
  0xb2   :  { %v98_v5 = vmax.f32 %v96_v3, 0.0  ;;  %v99_v6 = vmax.f32 %v97_v4, 0.0 }
  0xb4   :  { %378 = vmatprep.mubr.f32.mxu0 %v98_v5 }
  0xb5   :  { %379 = vmatmul.mubr.f32.vlgmr.msra.gmra.mrb[0].mxu0 %v99_v6 }
 0x188   :  { %v380_v11 = vpop.f32.mrb[0].mxu0 }
 0x189   :  { %v211_v12 = vadd.f32 %v380_v11, %v308_v10  ;;  %v205_v13 = vpop.f32.mrb[1].mxu0 }
 0x18a   :  { %v206_v14 = vadd.f32 %v308_v10, %v205_v13 }
 0x18b   :  { %v215_v16 = vmax.f32 %v211_v12, 0.0 }
 0x18c   :  { %v214_v15 = vmax.f32 %v206_v14, 0.0 }
 0x18e   :  { %413 = vmatprep.mubr.f32.mxu1 %v214_v15 }
 0x18f   :  { %414 = vmatmul.mubr.f32.vlgmr.msra.gmra.mrb[0].mxu1 %v215_v16 }
 0x262   :  { %v415_v18 = vpop.f32.mrb[0].mxu1 }
 0x263   :  { %v295_v19 = vadd.f32 %v415_v18, %v309_v17  ;;  %v289_v20 = vpop.f32.mrb[1].mxu1 }
 0x264   :  { %v290_v21 = vadd.f32 %v309_v17, %v289_v20 }
 0x265   :  { %300 = vst.msk [vmem:[%s639_s7 + $0x8] sm:$0xff] %vm298_vm0, %v295_v19 }
 0x266   :  { %299 = vst.msk [vmem:[%s639_s7] sm:$0xff] %vm298_vm0, %v290_v21 }
 0x267   :  { %305 = vsyncpa [#allocation3], 1 }
 0x268   :  { %306 = vsyncpa [#allocation5], 1 }

</bundles_post_ra>
